<compile_context>
chip_gen: v7x
topology: tpu7x:2x2x1
jax: 0.10.0
libtpu: 0.0.40
codegen_flags: <defaults>
</compile_context>

<pallas_src>
import functools

import jax
import jax.numpy as jnp
from jax.experimental import pallas as pl
from jax.experimental.pallas import tpu as pltpu


# ------------------------------- fused kernel --------------------------------

def _mv2_fused_kernel(xm_ref, xp_ref, xn_ref,          # main strip + clamped neighbour windows
                      w1_ref, s1_ref, b1_ref,          # 1x1 expand  (bf16 w, f32 folded BN)
                      wdw_ref, s2_ref, b2_ref,         # 3x3 depthwise taps + folded BN
                      w2_ref, s3_ref, b3_ref,          # 1x1 project + folded BN
                      o_ref,
                      xs_scr,                          # (Cin, P+2W+2) bf16 VMEM scratch
                      *, RS, W, nstrips, use_res, prev_off, next_off):
    """One grid step = one (batch, row-strip).  Channels on sublanes, flat pixels on lanes."""
    f32 = jnp.float32
    bf16 = jnp.bfloat16
    P = RS * W
    L = P + 2 * W + 2                                  # [z(1) | top row(W) | main(P) | bot row(W) | z(1)]
    cin = xs_scr.shape[0]
    i = pl.program_id(1)                               # strip index

    xm = xm_ref[0]                                     # (Cin, P) f32 (also the residual)

    # ---- assemble pw1 input columns (bf16) for ONE fused expand matmul ----
    zc = jnp.zeros((cin, 1), bf16)
    xs_scr[:, 0:1] = zc
    xs_scr[:, L - 1:L] = zc
    xs_scr[:, 1:1 + W] = xp_ref[0, :, prev_off:prev_off + W].astype(bf16)
    xs_scr[:, 1 + W:1 + W + P] = xm.astype(bf16)
    xs_scr[:, 1 + W + P:1 + 2 * W + P] = xn_ref[0, :, next_off:next_off + W].astype(bf16)

    # ---- 1x1 expand + BN + SiLU over main strip + halo rows (MXU + EUP) ----
    y = jnp.dot(w1_ref[...], xs_scr[...], preferred_element_type=f32)   # (hid, L)
    y = y * s1_ref[...] + b1_ref[...]
    h = y * jax.nn.sigmoid(y)                          # SiLU, f32

    # The 3x3 depthwise zero-pads the *hidden* activation: kill halo rows at image borders.
    lane = jax.lax.broadcasted_iota(jnp.int32, (1, L), 1)
    top_halo = jnp.logical_and(lane >= 1, lane < 1 + W)
    bot_halo = jnp.logical_and(lane >= 1 + W + P, lane < 1 + 2 * W + P)
    kill = jnp.logical_or(jnp.logical_and(i == 0, top_halo),
                          jnp.logical_and(i == nstrips - 1, bot_halo))
    h = jnp.where(kill, 0.0, h)

    # ---- lane-dense 3x3 depthwise + BN + SiLU: 9 shifted views + 2 column masks ----
    wdw = wdw_ref[...]                                 # (hid, 9) f32 taps, row-major
    colP = jax.lax.broadcasted_iota(jnp.int32, (1, P), 1)
    col = (colP & (W - 1)) if (W & (W - 1)) == 0 else (colP % W)
    not_first = col != 0                               # masks dx=0 taps at output column 0
    not_last = col != (W - 1)                          # masks dx=2 taps at output column W-1

    acc = None
    for dx in range(3):
        part = None
        for dy in range(3):
            tap = wdw[:, 3 * dy + dx:3 * dy + dx + 1]                  # (hid, 1)
            term = h[:, dy * W + dx:dy * W + dx + P] * tap             # shifted (hid, P) view
            part = term if part is None else part + term
        if dx == 0:
            part = jnp.where(not_first, part, 0.0)
        elif dx == 2:
            part = jnp.where(not_last, part, 0.0)
        acc = part if acc is None else acc + part

    d = acc * s2_ref[...] + b2_ref[...]
    d = d * jax.nn.sigmoid(d)                          # SiLU, f32 (hid, P)

    # ---- 1x1 project + BN (+ residual), lane-dense (Cout, P) output tile ----
    out = jnp.dot(w2_ref[...], d.astype(bf16), preferred_element_type=f32)
    out = out * s3_ref[...] + b3_ref[...]
    if use_res:                                        # static flag: no zeros tensor otherwise
        out = out + xm
    o_ref[0] = out


# ------------------------------ tiling heuristic ------------------------------

def _pick_strip_rows(H, W, hid, target_pixels=4096, vmem_budget_bytes=18 << 20):
    """Largest row-strip (multiple of 8, dividing H, RS*W % 128 == 0, <= target pixels,
    and a fused-activation footprint inside the VMEM budget).  Falls back to the whole image."""
    best = H
    for rs in range(8, H, 8):
        if H % rs or (rs * W) % 128:
            continue
        P = rs * W
        if P > target_pixels:
            continue
        if 6 * hid * (P + 2 * W + 2) * 4 > vmem_budget_bytes:
            continue
        best = rs
    return best


# ------------------------------- block wrapper --------------------------------

def mv2_block(x_nchw, params, stride=1, expansion=4):
    assert stride in (1, 2)
    # TODO(synk): expansion == 1 variant (no 1x1 expand conv) is a different PyTorch branch
    #             and is not implemented here.
    assert expansion != 1, "expansion==1 branch (pw1 skipped) not implemented"

    N, Cin, H, W = x_nchw.shape
    hidc = params["w_pw1"].shape[0]
    Cout = params["w_pw2"].shape[0]
    assert params["w_pw1"].shape[1] == Cin
    use_res = (stride == 1) and (Cin == Cout)

    RS = _pick_strip_rows(H, W, hidc)
    nstrips = H // RS
    P = RS * W
    HW = H * W

    # ---- minimal halo windows: only the one boundary row of each neighbour strip ----
    if W % 128 == 0:
        halo_lanes = W                                 # one image row per block
        prev_map = lambda n, i: (n, 0, jnp.maximum(i * RS - 1, 0))
        next_map = lambda n, i: (n, 0, jnp.minimum((i + 1) * RS, H - 1))
        prev_off, next_off = 0, 0
    elif P % 128 == 0 and 128 % W == 0:
        halo_lanes = 128                               # smallest aligned window holding the row
        bps = P // 128                                 # 128-lane blocks per strip
        nb = HW // 128
        prev_map = lambda n, i: (n, 0, jnp.maximum(i * bps - 1, 0))
        next_map = lambda n, i: (n, 0, jnp.minimum((i + 1) * bps, nb - 1))
        prev_off, next_off = 128 - W, 0
    else:
        halo_lanes = P                                 # fallback: full neighbour strip
        prev_map = lambda n, i: (n, 0, jnp.maximum(i - 1, 0))
        next_map = lambda n, i: (n, 0, jnp.minimum(i + 1, nstrips - 1))
        prev_off, next_off = P - W, 0

    x2 = x_nchw.astype(jnp.float32).reshape(N, Cin, HW)    # free reshape, NCHW kept
    w1 = params["w_pw1"].astype(jnp.bfloat16)
    w2 = params["w_pw2"].astype(jnp.bfloat16)

    kern = functools.partial(_mv2_fused_kernel, RS=RS, W=W, nstrips=nstrips,
                             use_res=use_res, prev_off=prev_off, next_off=next_off)

    strip_spec = pl.BlockSpec((1, Cin, P), lambda n, i: (n, 0, i))
    prev_spec = pl.BlockSpec((1, Cin, halo_lanes), prev_map)
    next_spec = pl.BlockSpec((1, Cin, halo_lanes), next_map)
    full = lambda shape: pl.BlockSpec(shape, lambda n, i: (0,) * len(shape))

    # Per-step VMEM estimate (double-buffered IO + fused activation live set).  Only raise
    # the scoped-VMEM limit when actually needed (v5e default 16 MiB; v7x physical 64 MiB).
    est = (2 * (Cin * P + 2 * Cin * halo_lanes) + 2 * Cout * P) * 4 \
        + 6 * hidc * (P + 2 * W + 2) * 4 + Cin * (P + 2 * W + 2) * 2
    cp_kwargs = dict(dimension_semantics=("parallel", "parallel"))
    if est > 12 * 2**20:
        cp_kwargs["vmem_limit_bytes"] = int(min(2 * est, 48 * 2**20))

    out2 = pl.pallas_call(
        kern,
        out_shape=jax.ShapeDtypeStruct((N, Cout, HW), jnp.float32),
        grid=(N, nstrips),
        in_specs=[
            strip_spec, prev_spec, next_spec,
            full((hidc, Cin)), full((hidc, 1)), full((hidc, 1)),
            full((hidc, 9)), full((hidc, 1)), full((hidc, 1)),
            full((Cout, hidc)), full((Cout, 1)), full((Cout, 1)),
        ],
        out_specs=pl.BlockSpec((1, Cout, P), lambda n, i: (n, 0, i)),
        scratch_shapes=[
            pltpu.VMEM((Cin, P + 2 * W + 2), jnp.bfloat16),   # assembled pw1 input columns
        ],
        compiler_params=pltpu.CompilerParams(**cp_kwargs),
    )(x2, x2, x2,
      w1, params["bn1_scale"].reshape(hidc, 1), params["bn1_bias"].reshape(hidc, 1),
      params["w_dw"], params["bn2_scale"].reshape(hidc, 1), params["bn2_bias"].reshape(hidc, 1),
      w2, params["bn3_scale"].reshape(Cout, 1), params["bn3_bias"].reshape(Cout, 1))

    out = out2.reshape(N, Cout, H, W)
    if stride == 2:
        # pw2 / BN are pointwise, so subsampling after them equals a stride-2 depthwise conv.
        # TODO(synk): move the stride-2 subsampling in-kernel (strided lane gather) to skip the
        #             extra depthwise/pw2 work and the full-resolution HBM writeback.
        out = out[:, :, ::2, ::2]
    return out


# ------------------------ deterministic parameter init ------------------------

def init_params(key, inp, oup, expansion=4, eps=1e-5):
    hid = inp * expansion
    ks = jax.random.split(key, 15)

    def bn(kg, kb, km, kv, c):
        gamma = 1.0 + 0.1 * jax.random.normal(kg, (c,), jnp.float32)
        beta = 0.1 * jax.random.normal(kb, (c,), jnp.float32)
        mean = 0.1 * jax.random.normal(km, (c,), jnp.float32)
        var = 1.0 + 0.1 * jax.random.uniform(kv, (c,), jnp.float32)
        scale = gamma / jnp.sqrt(var + eps)
        bias = beta - mean * scale
        return scale, bias

    p = {}
    p["w_pw1"] = 0.3 * jax.random.normal(ks[0], (hid, inp), jnp.float32)   # Conv2d(inp,hid,1)
    p["w_dw"] = 0.3 * jax.random.normal(ks[1], (hid, 9), jnp.float32)      # depthwise 3x3 taps
    p["w_pw2"] = 0.3 * jax.random.normal(ks[2], (oup, hid), jnp.float32)   # Conv2d(hid,oup,1)
    p["bn1_scale"], p["bn1_bias"] = bn(ks[3], ks[4], ks[5], ks[6], hid)
    p["bn2_scale"], p["bn2_bias"] = bn(ks[7], ks[8], ks[9], ks[10], hid)
    p["bn3_scale"], p["bn3_bias"] = bn(ks[11], ks[12], ks[13], ks[14], oup)
    return p


# ------------------------------ plain-JAX reference ----------------------------
# Mirrors the kernel's precision choices (bf16-rounded MXU operands, f32 accumulation/BN/SiLU).

def mv2_block_ref(x_nchw, params, stride=1):
    f32 = jnp.float32
    rnd = lambda a: a.astype(jnp.bfloat16).astype(f32)
    hi = jax.lax.Precision.HIGHEST
    silu = lambda v: v * jax.nn.sigmoid(v)

    x = x_nchw.astype(f32)
    N, Cin, H, W = x.shape
    hidc = params["w_pw1"].shape[0]
    Cout = params["w_pw2"].shape[0]

    x2 = x.reshape(N, Cin, H * W)
    y = jnp.einsum("hc,ncp->nhp", rnd(params["w_pw1"]), rnd(x2), precision=hi)
    y = y * params["bn1_scale"][None, :, None] + params["bn1_bias"][None, :, None]
    h = silu(y).reshape(N, hidc, H, W)

    hp = jnp.pad(h, ((0, 0), (0, 0), (1, 1), (1, 1)))
    acc = jnp.zeros_like(h)
    for dy in range(3):
        for dx in range(3):
            acc = acc + hp[:, :, dy:dy + H, dx:dx + W] * \
                params["w_dw"][:, 3 * dy + dx][None, :, None, None]
    d = silu(acc * params["bn2_scale"][None, :, None, None]
             + params["bn2_bias"][None, :, None, None])

    d2 = rnd(d.reshape(N, hidc, H * W))
    o = jnp.einsum("oh,nhp->nop", rnd(params["w_pw2"]), d2, precision=hi)
    o = o * params["bn3_scale"][None, :, None] + params["bn3_bias"][None, :, None]
    o = o.reshape(N, Cout, H, W)
    if stride == 1 and Cin == Cout:
        o = o + x
    if stride == 2:
        o = o[:, :, ::2, ::2]
    return o


# ----------------------------------- main --------------------------------------

if __name__ == "__main__":
    key = jax.random.PRNGKey(0)
    kx, kp1, kp2 = jax.random.split(key, 3)

    N, C, H, W = 2, 4, 16, 16
    x = jax.random.normal(kx, (N, C, H, W), jnp.float32)

    # Case 1: stride=1, inp == oup  -> residual connection used.
    params1 = init_params(kp1, inp=C, oup=C, expansion=4)
    out1 = jax.block_until_ready(mv2_block(x, params1, stride=1, expansion=4))
    ref1 = mv2_block_ref(x, params1, stride=1)
    assert out1.shape == (N, C, H, W), out1.shape
    assert jnp.allclose(out1, ref1, atol=2e-3, rtol=2e-3), \
        float(jnp.max(jnp.abs(out1 - ref1)))

    # Case 2: stride=2, inp != oup  -> no residual, spatial downsample.
    C2 = 8
    params2 = init_params(kp2, inp=C, oup=C2, expansion=4)
    out2 = jax.block_until_ready(mv2_block(x, params2, stride=2, expansion=4))
    ref2 = mv2_block_ref(x, params2, stride=2)
    assert out2.shape == (N, C2, H // 2, W // 2), out2.shape
    assert jnp.allclose(out2, ref2, atol=2e-3, rtol=2e-3), \
        float(jnp.max(jnp.abs(out2 - ref2)))

    print("KERNEL_OK")
</pallas_src>

<mosaic_0001>
module attributes {stable_mosaic.version = 11 : i64} {
  func.func @_mv2_fused_kernel(%arg0: i32, %arg1: i32, %arg2: memref<1x4x128xf32, #tpu.memory_space<vmem>>, %arg3: memref<1x4x128xf32, #tpu.memory_space<vmem>>, %arg4: memref<1x4x128xf32, #tpu.memory_space<vmem>>, %arg5: memref<16x4xbf16, #tpu.memory_space<vmem>>, %arg6: memref<16x1xf32, #tpu.memory_space<vmem>>, %arg7: memref<16x1xf32, #tpu.memory_space<vmem>>, %arg8: memref<16x9xf32, #tpu.memory_space<vmem>>, %arg9: memref<16x1xf32, #tpu.memory_space<vmem>>, %arg10: memref<16x1xf32, #tpu.memory_space<vmem>>, %arg11: memref<4x16xbf16, #tpu.memory_space<vmem>>, %arg12: memref<4x1xf32, #tpu.memory_space<vmem>>, %arg13: memref<4x1xf32, #tpu.memory_space<vmem>>, %arg14: memref<1x4x128xf32, #tpu.memory_space<vmem>>, %arg15: memref<4x162xbf16, #tpu.memory_space<vmem>>) attributes {dimension_semantics = [#tpu.dimension_semantics<parallel>, #tpu.dimension_semantics<parallel>], iteration_bounds = array<i64: 2, 2>, scalar_prefetch = 0 : i64, scratch_operands = 1 : i64, tpu.core_type = #tpu.core_type<tc>, window_params = [{transform_indices = @transform_0, window_bounds = array<i64: 1, 4, 128>}, {transform_indices = @transform_1, window_bounds = array<i64: 1, 4, 128>}, {transform_indices = @transform_2, window_bounds = array<i64: 1, 4, 128>}, {pipeline_mode = #tpu.pipeline_mode<synchronous>, transform_indices = @transform_3, window_bounds = array<i64: 16, 4>}, {pipeline_mode = #tpu.pipeline_mode<synchronous>, transform_indices = @transform_4, window_bounds = array<i64: 16, 1>}, {pipeline_mode = #tpu.pipeline_mode<synchronous>, transform_indices = @transform_5, window_bounds = array<i64: 16, 1>}, {pipeline_mode = #tpu.pipeline_mode<synchronous>, transform_indices = @transform_6, window_bounds = array<i64: 16, 9>}, {pipeline_mode = #tpu.pipeline_mode<synchronous>, transform_indices = @transform_7, window_bounds = array<i64: 16, 1>}, {pipeline_mode = #tpu.pipeline_mode<synchronous>, transform_indices = @transform_8, window_bounds = array<i64: 16, 1>}, {pipeline_mode = #tpu.pipeline_mode<synchronous>, transform_indices = @transform_9, window_bounds = array<i64: 4, 16>}, {pipeline_mode = #tpu.pipeline_mode<synchronous>, transform_indices = @transform_10, window_bounds = array<i64: 4, 1>}, {pipeline_mode = #tpu.pipeline_mode<synchronous>, transform_indices = @transform_11, window_bounds = array<i64: 4, 1>}, {transform_indices = @transform_12, window_bounds = array<i64: 1, 4, 128>}]} {
    %c0 = arith.constant 0 : index
    %c0_0 = arith.constant 0 : index
    %c0_1 = arith.constant 0 : index
    %0 = vector.load %arg2[%c0, %c0_0, %c0_1] : memref<1x4x128xf32, #tpu.memory_space<vmem>>, vector<1x4x128xf32>
    %1 = vector.shape_cast %0 : vector<1x4x128xf32> to vector<4x128xf32>
    %cst = arith.constant 0.000000e+00 : bf16
    %2 = vector.broadcast %cst : bf16 to vector<4x1xbf16>
    %c0_2 = arith.constant 0 : index
    %c0_3 = arith.constant 0 : index
    %3 = vector.load %arg15[%c0_2, %c0_3] : memref<4x162xbf16, #tpu.memory_space<vmem>>, vector<4x1xbf16>
    tpu.vector_store %arg15[%c0_2, %c0_3], %2 {strides = array<i32>} : memref<4x162xbf16, #tpu.memory_space<vmem>>, vector<4x1xbf16>,
    %c0_4 = arith.constant 0 : index
    %c161 = arith.constant 161 : index
    %4 = vector.load %arg15[%c0_4, %c161] : memref<4x162xbf16, #tpu.memory_space<vmem>>, vector<4x1xbf16>
    tpu.vector_store %arg15[%c0_4, %c161], %2 {strides = array<i32>} : memref<4x162xbf16, #tpu.memory_space<vmem>>, vector<4x1xbf16>,
    %c0_5 = arith.constant 0 : index
    %c0_6 = arith.constant 0 : index
    %c112 = arith.constant 112 : index
    %5 = vector.load %arg3[%c0_5, %c0_6, %c112] : memref<1x4x128xf32, #tpu.memory_space<vmem>>, vector<1x4x16xf32>
    %6 = vector.shape_cast %5 : vector<1x4x16xf32> to vector<4x16xf32>
    %7 = arith.truncf %6 : vector<4x16xf32> to vector<4x16xbf16>
    %c0_7 = arith.constant 0 : index
    %c1 = arith.constant 1 : index
    %8 = vector.load %arg15[%c0_7, %c1] : memref<4x162xbf16, #tpu.memory_space<vmem>>, vector<4x16xbf16>
    tpu.vector_store %arg15[%c0_7, %c1], %7 {strides = array<i32>} : memref<4x162xbf16, #tpu.memory_space<vmem>>, vector<4x16xbf16>,
    %9 = arith.truncf %1 : vector<4x128xf32> to vector<4x128xbf16>
    %c0_8 = arith.constant 0 : index
    %c17 = arith.constant 17 : index
    %10 = vector.load %arg15[%c0_8, %c17] : memref<4x162xbf16, #tpu.memory_space<vmem>>, vector<4x128xbf16>
    tpu.vector_store %arg15[%c0_8, %c17], %9 {strides = array<i32>} : memref<4x162xbf16, #tpu.memory_space<vmem>>, vector<4x128xbf16>,
    %c0_9 = arith.constant 0 : index
    %c0_10 = arith.constant 0 : index
    %c0_11 = arith.constant 0 : index
    %11 = vector.load %arg4[%c0_9, %c0_10, %c0_11] : memref<1x4x128xf32, #tpu.memory_space<vmem>>, vector<1x4x16xf32>
    %12 = vector.shape_cast %11 : vector<1x4x16xf32> to vector<4x16xf32>
    %13 = arith.truncf %12 : vector<4x16xf32> to vector<4x16xbf16>
    %c0_12 = arith.constant 0 : index
    %c145 = arith.constant 145 : index
    %14 = vector.load %arg15[%c0_12, %c145] : memref<4x162xbf16, #tpu.memory_space<vmem>>, vector<4x16xbf16>
    tpu.vector_store %arg15[%c0_12, %c145], %13 {strides = array<i32>} : memref<4x162xbf16, #tpu.memory_space<vmem>>, vector<4x16xbf16>,
    %c0_13 = arith.constant 0 : index
    %c0_14 = arith.constant 0 : index
    %15 = vector.load %arg5[%c0_13, %c0_14] : memref<16x4xbf16, #tpu.memory_space<vmem>>, vector<16x4xbf16>
    %c0_15 = arith.constant 0 : index
    %c0_16 = arith.constant 0 : index
    %16 = vector.load %arg15[%c0_15, %c0_16] : memref<4x162xbf16, #tpu.memory_space<vmem>>, vector<4x162xbf16>
    %cst_17 = arith.constant dense<0.000000e+00> : vector<16x162xf32>
    %17 = tpu.matmul %15, %16, %cst_17 {dimension_numbers = #tpu.dot_dimension_numbers<[1], [0], [0], [1], [0, 0, 1, 1], [], []>} : vector<16x4xbf16>, vector<4x162xbf16>, vector<16x162xf32> -> vector<16x162xf32>
    %c0_18 = arith.constant 0 : index
    %c0_19 = arith.constant 0 : index
    %18 = vector.load %arg6[%c0_18, %c0_19] : memref<16x1xf32, #tpu.memory_space<vmem>>, vector<16x1xf32>
    %19 = vector.broadcast %18 : vector<16x1xf32> to vector<16x162xf32>
    %20 = arith.mulf %17, %19 : vector<16x162xf32>
    %c0_20 = arith.constant 0 : index
    %c0_21 = arith.constant 0 : index
    %21 = vector.load %arg7[%c0_20, %c0_21] : memref<16x1xf32, #tpu.memory_space<vmem>>, vector<16x1xf32>
    %22 = vector.broadcast %21 : vector<16x1xf32> to vector<16x162xf32>
    %23 = arith.addf %20, %22 : vector<16x162xf32>
    %24 = arith.negf %23 : vector<16x162xf32>
    %25 = math.exp %24 : vector<16x162xf32>
    %cst_22 = arith.constant 1.000000e+00 : f32
    %26 = vector.broadcast %cst_22 : f32 to vector<16x162xf32>
    %27 = arith.addf %26, %25 : vector<16x162xf32>
    %28 = arith.divf %26, %27 : vector<16x162xf32>
    %29 = arith.mulf %23, %28 : vector<16x162xf32>
    %30 = tpu.iota {dimensions = array<i32: 1>} : vector<1x162xi32>
    %c1_i32 = arith.constant 1 : i32
    %31 = vector.broadcast %c1_i32 : i32 to vector<1x162xi32>
    %32 = arith.cmpi sge, %30, %31 : vector<1x162xi32>
    %c17_i32 = arith.constant 17 : i32
    %33 = vector.broadcast %c17_i32 : i32 to vector<1x162xi32>
    %34 = arith.cmpi slt, %30, %33 : vector<1x162xi32>
    %35 = arith.andi %32, %34 : vector<1x162xi1>
    %c145_i32 = arith.constant 145 : i32
    %36 = vector.broadcast %c145_i32 : i32 to vector<1x162xi32>
    %37 = arith.cmpi sge, %30, %36 : vector<1x162xi32>
    %c161_i32 = arith.constant 161 : i32
    %38 = vector.broadcast %c161_i32 : i32 to vector<1x162xi32>
    %39 = arith.cmpi slt, %30, %38 : vector<1x162xi32>
    %40 = arith.andi %37, %39 : vector<1x162xi1>
    %c0_i32 = arith.constant 0 : i32
    %41 = arith.cmpi eq, %arg1, %c0_i32 : i32
    %42 = vector.broadcast %41 : i1 to vector<1x162xi1>
    %43 = arith.andi %42, %35 : vector<1x162xi1>
    %c1_i32_23 = arith.constant 1 : i32
    %44 = arith.cmpi eq, %arg1, %c1_i32_23 : i32
    %45 = vector.broadcast %44 : i1 to vector<1x162xi1>
    %46 = arith.andi %45, %40 : vector<1x162xi1>
    %47 = arith.ori %43, %46 : vector<1x162xi1>
    %cst_24 = arith.constant 0.000000e+00 : f32
    %48 = vector.shape_cast %47 : vector<1x162xi1> to vector<1x162xi1>
    %49 = vector.broadcast %48 : vector<1x162xi1> to vector<16x162xi1>
    %50 = vector.broadcast %cst_24 : f32 to vector<16x162xf32>
    %51 = arith.select %49, %50, %29 : vector<16x162xi1>, vector<16x162xf32>
    %c0_25 = arith.constant 0 : index
    %c0_26 = arith.constant 0 : index
    %52 = vector.load %arg8[%c0_25, %c0_26] : memref<16x9xf32, #tpu.memory_space<vmem>>, vector<16x9xf32>
    %53 = tpu.iota {dimensions = array<i32: 1>} : vector<1x128xi32>
    %c15_i32 = arith.constant 15 : i32
    %54 = vector.broadcast %c15_i32 : i32 to vector<1x128xi32>
    %55 = arith.andi %53, %54 : vector<1x128xi32>
    %c0_i32_27 = arith.constant 0 : i32
    %56 = vector.broadcast %c0_i32_27 : i32 to vector<1x128xi32>
    %57 = arith.cmpi ne, %55, %56 : vector<1x128xi32>
    %c15_i32_28 = arith.constant 15 : i32
    %58 = vector.broadcast %c15_i32_28 : i32 to vector<1x128xi32>
    %59 = arith.cmpi ne, %55, %58 : vector<1x128xi32>
    %60 = vector.extract_strided_slice %52 {offsets = [0, 0], sizes = [16, 1], strides = [1, 1]} : vector<16x9xf32> to vector<16x1xf32>
    %61 = vector.extract_strided_slice %51 {offsets = [0, 0], sizes = [16, 128], strides = [1, 1]} : vector<16x162xf32> to vector<16x128xf32>
    %62 = vector.broadcast %60 : vector<16x1xf32> to vector<16x128xf32>
    %63 = arith.mulf %61, %62 : vector<16x128xf32>
    %64 = vector.extract_strided_slice %52 {offsets = [0, 3], sizes = [16, 1], strides = [1, 1]} : vector<16x9xf32> to vector<16x1xf32>
    %65 = vector.extract_strided_slice %51 {offsets = [0, 16], sizes = [16, 128], strides = [1, 1]} : vector<16x162xf32> to vector<16x128xf32>
    %66 = vector.broadcast %64 : vector<16x1xf32> to vector<16x128xf32>
    %67 = arith.mulf %65, %66 : vector<16x128xf32>
    %68 = arith.addf %63, %67 : vector<16x128xf32>
    %69 = vector.extract_strided_slice %52 {offsets = [0, 6], sizes = [16, 1], strides = [1, 1]} : vector<16x9xf32> to vector<16x1xf32>
    %70 = vector.extract_strided_slice %51 {offsets = [0, 32], sizes = [16, 128], strides = [1, 1]} : vector<16x162xf32> to vector<16x128xf32>
    %71 = vector.broadcast %69 : vector<16x1xf32> to vector<16x128xf32>
    %72 = arith.mulf %70, %71 : vector<16x128xf32>
    %73 = arith.addf %68, %72 : vector<16x128xf32>
    %cst_29 = arith.constant 0.000000e+00 : f32
    %74 = vector.shape_cast %57 : vector<1x128xi1> to vector<1x128xi1>
    %75 = vector.broadcast %74 : vector<1x128xi1> to vector<16x128xi1>
    %76 = vector.broadcast %cst_29 : f32 to vector<16x128xf32>
    %77 = arith.select %75, %73, %76 : vector<16x128xi1>, vector<16x128xf32>
    %78 = vector.extract_strided_slice %52 {offsets = [0, 1], sizes = [16, 1], strides = [1, 1]} : vector<16x9xf32> to vector<16x1xf32>
    %79 = vector.extract_strided_slice %51 {offsets = [0, 1], sizes = [16, 128], strides = [1, 1]} : vector<16x162xf32> to vector<16x128xf32>
    %80 = vector.broadcast %78 : vector<16x1xf32> to vector<16x128xf32>
    %81 = arith.mulf %79, %80 : vector<16x128xf32>
    %82 = vector.extract_strided_slice %52 {offsets = [0, 4], sizes = [16, 1], strides = [1, 1]} : vector<16x9xf32> to vector<16x1xf32>
    %83 = vector.extract_strided_slice %51 {offsets = [0, 17], sizes = [16, 128], strides = [1, 1]} : vector<16x162xf32> to vector<16x128xf32>
    %84 = vector.broadcast %82 : vector<16x1xf32> to vector<16x128xf32>
    %85 = arith.mulf %83, %84 : vector<16x128xf32>
    %86 = arith.addf %81, %85 : vector<16x128xf32>
    %87 = vector.extract_strided_slice %52 {offsets = [0, 7], sizes = [16, 1], strides = [1, 1]} : vector<16x9xf32> to vector<16x1xf32>
    %88 = vector.extract_strided_slice %51 {offsets = [0, 33], sizes = [16, 128], strides = [1, 1]} : vector<16x162xf32> to vector<16x128xf32>
    %89 = vector.broadcast %87 : vector<16x1xf32> to vector<16x128xf32>
    %90 = arith.mulf %88, %89 : vector<16x128xf32>
    %91 = arith.addf %86, %90 : vector<16x128xf32>
    %92 = arith.addf %77, %91 : vector<16x128xf32>
    %93 = vector.extract_strided_slice %52 {offsets = [0, 2], sizes = [16, 1], strides = [1, 1]} : vector<16x9xf32> to vector<16x1xf32>
    %94 = vector.extract_strided_slice %51 {offsets = [0, 2], sizes = [16, 128], strides = [1, 1]} : vector<16x162xf32> to vector<16x128xf32>
    %95 = vector.broadcast %93 : vector<16x1xf32> to vector<16x128xf32>
    %96 = arith.mulf %94, %95 : vector<16x128xf32>
    %97 = vector.extract_strided_slice %52 {offsets = [0, 5], sizes = [16, 1], strides = [1, 1]} : vector<16x9xf32> to vector<16x1xf32>
    %98 = vector.extract_strided_slice %51 {offsets = [0, 18], sizes = [16, 128], strides = [1, 1]} : vector<16x162xf32> to vector<16x128xf32>
    %99 = vector.broadcast %97 : vector<16x1xf32> to vector<16x128xf32>
    %100 = arith.mulf %98, %99 : vector<16x128xf32>
    %101 = arith.addf %96, %100 : vector<16x128xf32>
    %102 = vector.extract_strided_slice %52 {offsets = [0, 8], sizes = [16, 1], strides = [1, 1]} : vector<16x9xf32> to vector<16x1xf32>
    %103 = vector.extract_strided_slice %51 {offsets = [0, 34], sizes = [16, 128], strides = [1, 1]} : vector<16x162xf32> to vector<16x128xf32>
    %104 = vector.broadcast %102 : vector<16x1xf32> to vector<16x128xf32>
    %105 = arith.mulf %103, %104 : vector<16x128xf32>
    %106 = arith.addf %101, %105 : vector<16x128xf32>
    %cst_30 = arith.constant 0.000000e+00 : f32
    %107 = vector.shape_cast %59 : vector<1x128xi1> to vector<1x128xi1>
    %108 = vector.broadcast %107 : vector<1x128xi1> to vector<16x128xi1>
    %109 = vector.broadcast %cst_30 : f32 to vector<16x128xf32>
    %110 = arith.select %108, %106, %109 : vector<16x128xi1>, vector<16x128xf32>
    %111 = arith.addf %92, %110 : vector<16x128xf32>
    %c0_31 = arith.constant 0 : index
    %c0_32 = arith.constant 0 : index
    %112 = vector.load %arg9[%c0_31, %c0_32] : memref<16x1xf32, #tpu.memory_space<vmem>>, vector<16x1xf32>
    %113 = vector.broadcast %112 : vector<16x1xf32> to vector<16x128xf32>
    %114 = arith.mulf %111, %113 : vector<16x128xf32>
    %c0_33 = arith.constant 0 : index
    %c0_34 = arith.constant 0 : index
    %115 = vector.load %arg10[%c0_33, %c0_34] : memref<16x1xf32, #tpu.memory_space<vmem>>, vector<16x1xf32>
    %116 = vector.broadcast %115 : vector<16x1xf32> to vector<16x128xf32>
    %117 = arith.addf %114, %116 : vector<16x128xf32>
    %118 = arith.negf %117 : vector<16x128xf32>
    %119 = math.exp %118 : vector<16x128xf32>
    %cst_35 = arith.constant 1.000000e+00 : f32
    %120 = vector.broadcast %cst_35 : f32 to vector<16x128xf32>
    %121 = arith.addf %120, %119 : vector<16x128xf32>
    %122 = arith.divf %120, %121 : vector<16x128xf32>
    %123 = arith.mulf %117, %122 : vector<16x128xf32>
    %c0_36 = arith.constant 0 : index
    %c0_37 = arith.constant 0 : index
    %124 = vector.load %arg11[%c0_36, %c0_37] : memref<4x16xbf16, #tpu.memory_space<vmem>>, vector<4x16xbf16>
    %125 = arith.truncf %123 : vector<16x128xf32> to vector<16x128xbf16>
    %cst_38 = arith.constant dense<0.000000e+00> : vector<4x128xf32>
    %126 = tpu.matmul %124, %125, %cst_38 {dimension_numbers = #tpu.dot_dimension_numbers<[1], [0], [0], [1], [0, 0, 1, 1], [], []>} : vector<4x16xbf16>, vector<16x128xbf16>, vector<4x128xf32> -> vector<4x128xf32>
    %c0_39 = arith.constant 0 : index
    %c0_40 = arith.constant 0 : index
    %127 = vector.load %arg12[%c0_39, %c0_40] : memref<4x1xf32, #tpu.memory_space<vmem>>, vector<4x1xf32>
    %128 = vector.broadcast %127 : vector<4x1xf32> to vector<4x128xf32>
    %129 = arith.mulf %126, %128 : vector<4x128xf32>
    %c0_41 = arith.constant 0 : index
    %c0_42 = arith.constant 0 : index
    %130 = vector.load %arg13[%c0_41, %c0_42] : memref<4x1xf32, #tpu.memory_space<vmem>>, vector<4x1xf32>
    %131 = vector.broadcast %130 : vector<4x1xf32> to vector<4x128xf32>
    %132 = arith.addf %129, %131 : vector<4x128xf32>
    %133 = arith.addf %132, %1 : vector<4x128xf32>
    %c0_43 = arith.constant 0 : index
    %c0_44 = arith.constant 0 : index
    %c0_45 = arith.constant 0 : index
    %134 = vector.load %arg14[%c0_43, %c0_44, %c0_45] : memref<1x4x128xf32, #tpu.memory_space<vmem>>, vector<1x4x128xf32>
    %135 = vector.shape_cast %134 : vector<1x4x128xf32> to vector<4x128xf32>
    %136 = vector.shape_cast %133 : vector<4x128xf32> to vector<1x4x128xf32>
    tpu.vector_store %arg14[%c0_43, %c0_44, %c0_45], %136 {strides = array<i32>} : memref<1x4x128xf32, #tpu.memory_space<vmem>>, vector<1x4x128xf32>,
    return
  }
  func.func @transform_0(%arg0: i32, %arg1: i32) -> (i32, i32, i32) {
    %c0_i32 = arith.constant 0 : i32
    %c0_i32_0 = arith.constant 0 : i32
    return %arg0, %c0_i32, %arg1 : i32, i32, i32
  }
  func.func @transform_1(%arg0: i32, %arg1: i32) -> (i32, i32, i32) {
    %c1_i32 = arith.constant 1 : i32
    %0 = arith.muli %arg1, %c1_i32 : i32
    %c1_i32_0 = arith.constant 1 : i32
    %1 = arith.subi %0, %c1_i32_0 : i32
    %c0_i32 = arith.constant 0 : i32
    %2 = arith.maxsi %1, %c0_i32 : i32
    %c0_i32_1 = arith.constant 0 : i32
    %c0_i32_2 = arith.constant 0 : i32
    return %arg0, %c0_i32_1, %2 : i32, i32, i32
  }
  func.func @transform_2(%arg0: i32, %arg1: i32) -> (i32, i32, i32) {
    %c1_i32 = arith.constant 1 : i32
    %0 = arith.addi %arg1, %c1_i32 : i32
    %c1_i32_0 = arith.constant 1 : i32
    %1 = arith.muli %0, %c1_i32_0 : i32
    %c1_i32_1 = arith.constant 1 : i32
    %2 = arith.minsi %1, %c1_i32_1 : i32
    %c0_i32 = arith.constant 0 : i32
    %c0_i32_2 = arith.constant 0 : i32
    return %arg0, %c0_i32, %2 : i32, i32, i32
  }
  func.func @transform_3(%arg0: i32, %arg1: i32) -> (i32, i32) {
    %c0_i32 = arith.constant 0 : i32
    %c0_i32_0 = arith.constant 0 : i32
    %c0_i32_1 = arith.constant 0 : i32
    return %c0_i32, %c0_i32_0 : i32, i32
  }
  func.func @transform_4(%arg0: i32, %arg1: i32) -> (i32, i32) {
    %c0_i32 = arith.constant 0 : i32
    %c0_i32_0 = arith.constant 0 : i32
    %c0_i32_1 = arith.constant 0 : i32
    return %c0_i32, %c0_i32_0 : i32, i32
  }
  func.func @transform_5(%arg0: i32, %arg1: i32) -> (i32, i32) {
    %c0_i32 = arith.constant 0 : i32
    %c0_i32_0 = arith.constant 0 : i32
    %c0_i32_1 = arith.constant 0 : i32
    return %c0_i32, %c0_i32_0 : i32, i32
  }
  func.func @transform_6(%arg0: i32, %arg1: i32) -> (i32, i32) {
    %c0_i32 = arith.constant 0 : i32
    %c0_i32_0 = arith.constant 0 : i32
    %c0_i32_1 = arith.constant 0 : i32
    return %c0_i32, %c0_i32_0 : i32, i32
  }
  func.func @transform_7(%arg0: i32, %arg1: i32) -> (i32, i32) {
    %c0_i32 = arith.constant 0 : i32
    %c0_i32_0 = arith.constant 0 : i32
    %c0_i32_1 = arith.constant 0 : i32
    return %c0_i32, %c0_i32_0 : i32, i32
  }
  func.func @transform_8(%arg0: i32, %arg1: i32) -> (i32, i32) {
    %c0_i32 = arith.constant 0 : i32
    %c0_i32_0 = arith.constant 0 : i32
    %c0_i32_1 = arith.constant 0 : i32
    return %c0_i32, %c0_i32_0 : i32, i32
  }
  func.func @transform_9(%arg0: i32, %arg1: i32) -> (i32, i32) {
    %c0_i32 = arith.constant 0 : i32
    %c0_i32_0 = arith.constant 0 : i32
    %c0_i32_1 = arith.constant 0 : i32
    return %c0_i32, %c0_i32_0 : i32, i32
  }
  func.func @transform_10(%arg0: i32, %arg1: i32) -> (i32, i32) {
    %c0_i32 = arith.constant 0 : i32
    %c0_i32_0 = arith.constant 0 : i32
    %c0_i32_1 = arith.constant 0 : i32
    return %c0_i32, %c0_i32_0 : i32, i32
  }
  func.func @transform_11(%arg0: i32, %arg1: i32) -> (i32, i32) {
    %c0_i32 = arith.constant 0 : i32
    %c0_i32_0 = arith.constant 0 : i32
    %c0_i32_1 = arith.constant 0 : i32
    return %c0_i32, %c0_i32_0 : i32, i32
  }
  func.func @transform_12(%arg0: i32, %arg1: i32) -> (i32, i32, i32) {
    %c0_i32 = arith.constant 0 : i32
    %c0_i32_0 = arith.constant 0 : i32
    return %arg0, %c0_i32, %arg1 : i32, i32, i32
  }
}

</mosaic_0001>

<bundles_post_ra>
// kernel: tpu_custom_call.1
= control target key start
LH: loop header
LB: loop body
LE: loop exit
PB: predicated region body
PF: predicated region fallthrough
CT: control target
= control target key end

     0   :  { %s2023_s0 = inlined_call_operand.vmem [shape: f32[2,4,256], index: 0, kind: input, shape index: {}]   ;;  %s2024_s1 = inlined_call_operand.vmem [shape: f32[2,4,256], index: 1, kind: input, shape index: {}]   ;;  %s2025_s2 = inlined_call_operand.vmem [shape: f32[2,4,256], index: 2, kind: input, shape index: {}]   ;;  %s2026_s3 = inlined_call_operand.vmem [shape: bf16[16,4], index: 3, kind: input, shape index: {}]   ;;  %s2027_s4 = inlined_call_operand.vmem [shape: f32[16,1], index: 4, kind: input, shape index: {}]   ;;  %s2028_s5 = inlined_call_operand.vmem [shape: f32[16,1], index: 5, kind: input, shape index: {}]   ;;  %s2029_s6 = inlined_call_operand.vmem [shape: f32[16,9], index: 6, kind: input, shape index: {}]   ;;  %s2030_s7 = inlined_call_operand.vmem [shape: f32[16,1], index: 7, kind: input, shape index: {}]   ;;  %s2031_s8 = inlined_call_operand.vmem [shape: f32[16,1], index: 8, kind: input, shape index: {}]   ;;  %s2032_s9 = inlined_call_operand.vmem [shape: bf16[4,16], index: 9, kind: input, shape index: {}]   ;;  %s2033_s10 = inlined_call_operand.vmem [shape: f32[4,1], index: 10, kind: input, shape index: {}]   ;;  %s2034_s11 = inlined_call_operand.vmem [shape: f32[4,1], index: 11, kind: input, shape index: {}]   ;;  %s2035_s12 = inlined_call_operand.hbm [shape: f32[2,4,256], index: 12, kind: output, shape index: {}]  }
   0x1   :  { %2043 = sst [smem:[#allocation14_spill]] %s2023_s0 }
   0x2   :  { %17 = vsyncpa [#allocation4], 0 }
   0x3   :  { %19 = vsyncpa [#allocation4 + $0x1], 0  ;;  %s1642_s21 = smov 0   ;;  %s1644_s22 = smov 0  }
   0x4   :  { %s1646_s23 = smov 0   ;;  %s1648_s24 = smov 0  }
   0x5   :  { %s1650_s25 = smov 0   ;;  %s1652_s26 = smov 0  }
   0x6   :  { %s1654_s27 = smov 0   ;;  %s1656_s28 = smov 0  }
   0x7 LB: > { %2044 = sst [smem:[#allocation6_spill]] %s1529_s21  ;;  %s1283_s29 = sadd.s32 4294967295, %s1557_s28   ;;  %s1557_s28 = sphi %s1656_s28, %s25_s28   ;;  %s1553_s27 = sphi %s1654_s27, %s2074_s27   ;;  %s1549_s26 = sphi %s1652_s26, %s2073_s26   ;;  %s1545_s25 = sphi %s1650_s25, %s2072_s25   ;;  %s1541_s24 = sphi %s1648_s24, %s2071_s24   ;;  %s1537_s23 = sphi %s1646_s23, %s2070_s23   ;;  %s1533_s22 = sphi %s1644_s22, %s2076_s22   ;;  %s1529_s21 = sphi %s1642_s21, %s2075_s21  }
   0x8   : > { %2045 = sst [smem:[#allocation7_spill]] %s1537_s23  ;;  %s1284_s30 = sadd.s32 4294967294, %s1557_s28  }
   0x9   : > { %2046 = sst [smem:[#allocation8_spill]] %s1549_s26  ;;  %s34_s13 = sadd.s32 1, %s1549_s26 }
   0xa   : > { %2047 = sst [smem:[#allocation9_spill]] %s1553_s27  ;;  %p35_p0 = scmp.ge.s32.totalorder %s34_s13, 2 }
   0xb   : > { %s37_s14 = sadd.s32 1, %s1553_s27  ;;  %p341_p1 = scmp.ne.s32.totalorder %s1537_s23, %s1533_s22 }
   0xc   : > { %p342_p2 = scmp.eq.s32.totalorder %s1283_s29, 3  ;;  %s2078_s13 = smov (%p35_p0, %s34_s13), 0 }
   0xd   : > { %2048 = sst [smem:[#allocation10_spill]] %s2078_s13  ;;  %s2080_s14 = smov (!%p35_p0, %s37_s14), %s1553_s27 }
   0xe   : > { %s327_s15 = ssub.s32 %s1549_s26, %s2078_s13  ;;  %p1693_p3 = por %p342_p2, %p341_p1 }
   0xf   : > { %p39_p4 = scmp.ge.s32.totalorder %s2080_s14, 2  ;;  %p347_p5 = scmp.ne.s32.totalorder %s1533_s22, %s1529_s21 }
  0x10   : > { %p348_p6 = scmp.eq.s32.totalorder %s1284_s30, 3  ;;  %p1289_p7 = scmp.ge.s32.totalorder %s1557_s28, 1 }
  0x11   : > { %s2082_s14 = smov (%p39_p4, %s2080_s14), 0  ;;  %p438_p9 = scmp.lt.s32.totalorder %s1557_s28, 5 }
  0x12   : > { %2050 = sst [smem:[#allocation11_spill]] %s2082_s14  ;;  %p1702_p8 = por %p348_p6, %p347_p5 }
  0x13   : > { %s326_s18 = ssub.s32 %s1553_s27, %s2082_s14  ;;  %s331_s19 = sadd.s32 1, %s1537_s23 }
  0x14   : > { %s2051_s17 = scalar_select %p1702_p8, 1, 0 }
  0x15   : > { %s328_s20 = sor.u32 %s327_s15, %s326_s18  ;;  %p439_p10 = pnand %p1289_p7, %p438_p9 }
  0x16   : > { %2052 = sst [smem:[#allocation12_spill]] %s2051_s17  ;;  %p329_p11 = scmp.eq.s32.totalorder %s328_s20, 0  ;;  %v553_v0 = vlaneseq (!%p439_p10)  ;;  %v1559_v1 = vmov (!%p439_p10), 1983009808   ;;  %vm543_vm0 = vcmask (!%p439_p10), 1024   ;;  %v1560_v5 = vmov (!%p439_p10), 0  }
  0x17   : > { %442 = sbr.rel (%p439_p10) target bundleno = 961 (0x3c1), region = 68  ;;  %p505_p12 = scmp.lt.s32.totalorder (!%p439_p10), %s1545_s25, 1  ;;  %v551_v2 = vunpack.c.l.s4 (!%p439_p10), %v1559_v1  ;;  %544 = vst.msk [vmem:[#allocation2] sm:$0x3] (!%p439_p10), %vm543_vm0, %v1560_v5  ;;  %656 = vmatprep.mubr.bf16.mxu0 (!%p439_p10), %v1560_v5  ;;  %1420 = vset.pattern.permute.xlu1 (!%p439_p10), %v1560_v5  ;;  %vm545_vm1 = vcmask (!%p439_p10), 271624   ;;  %v667_v16 = vld [vmem:[%s2027_s4] sm:$0xff] (!%p439_p10) }
  0x18   : > { %s1711_s29 = scalar_select %p329_p11, %s1537_s23, %s331_s19  }
  0x19   : > { %p507_p13 = scmp.lt.s32.totalorder (!%p439_p10), %s1541_s24, 1  ;;  %s1293_s30 = sadd.s32 (!%p439_p10), 4294967295, %s1541_s24  ;;  %v552_v3 = vunpack.c.0.s8 (!%p439_p10), %v551_v2  ;;  %v554_v4 = vshrl.u32 (!%p439_p10), %v553_v0, 7  ;;  %1421 = vset.pattern.permute.xlu0 (!%p439_p10), %v1560_v5  ;;  %546 = vst.msk [vmem:[#allocation2 + $0x2] sm:$0x3] (!%p439_p10), %vm545_vm1, %v1560_v5  ;;  %v668_v17 = vld [vmem:[%s2027_s4 + $0x8] sm:$0xff] (!%p439_p10) }
  0x1a   : > { %2053 = sst [smem:[#allocation13_spill]] %s1711_s29  ;;  %p514_p0 = scmp.gt.s32.totalorder (!%p439_p10), %s1293_s30, 0  ;;  %v683_v18 = vld [vmem:[%s2028_s5] sm:$0xff] (!%p439_p10)  ;;  %v1562_v20 = vmov (!%p439_p10), 4   ;;  %v684_v21 = vld [vmem:[%s2028_s5 + $0x8] sm:$0xff] (!%p439_p10)  ;;  %v1563_v23 = vmov (!%p439_p10), 5  }
  0x1b   : > { %p1294_p1 = scmp.lt.s32.totalorder (!%p439_p10), %s1293_s30, 1  ;;  %s527_s13 = sadd.s32 (!%p439_p10), 1, %s1541_s24  ;;  %v555_v6 = vsub.s32 (!%p439_p10), %v552_v3, %v554_v4  ;;  %v1750_v19 = vld [vmem:[%s2029_s6] sm:$0xff] (!%p439_p10)  ;;  %v1759_v22 = vld [vmem:[%s2029_s6 + $0x8] sm:$0xff] (!%p439_p10)  ;;  %v1564_v24 = vmov (!%p439_p10), 8   ;;  %v1565_v25 = vmov (!%p439_p10), 3  }
  0x1c   : > { %s2054_s0 = sld [smem:[#allocation14_spill]] (!%p439_p10)  ;;  %p528_p2 = scmp.lt.s32.totalorder (!%p439_p10), %s527_s13, 1  ;;  %v1566_v26 = vmov (!%p439_p10), 7   ;;  %v1567_v27 = vmov (!%p439_p10), 6   ;;  %v1568_v28 = vmov (!%p439_p10), 2   ;;  %v1569_v29 = vmov (!%p439_p10), 1  }
  0x1d   : > { %vm577_vm2 = vcmask (!%p439_p10), 1041544   ;;  %vm578_vm3 = vcmask (!%p439_p10), 134146   ;;  %vm574_vm4 = vcmask (!%p439_p10), 138240   ;;  %vm560_vm5 = vcmask (!%p439_p10), 132104   ;;  %v1438_v38 = vld [vmem:[%s2026_s3] sm:$0xff] (!%p439_p10)   ;;  %p742_p4 = scmp.eq.s32.totalorder (!%p439_p10), %s1541_s24, 0 }
  0x1e   : > { %s506_s14 = scalar_select %p505_p12, %s1545_s25, 1  ;;  %vm579_vm6 = vmor %vm578_vm3, %vm577_vm2  ;;  %vm594_vm7 = vcmask 263304   ;;  %vm617_vm8 = vcmask 1041408   ;;  %vm613_vm9 = vcmask 31744   ;;  %v1787_v63 = vand.u32 127, %v553_v0 }
  0x1f   : > { %s508_s15 = scalar_select %p507_p13, %s1541_s24, 1 }
  0x20   : > { %s1291_s18 = sshll.u32 %s506_s14, 1  ;;  %s2084_s30 = smov (!%p514_p0, %s1293_s30), 0  ;;  %vm730_vm10 = vcmp.ge.s32.totalorder %v1787_v63, 1  ;;  %vm732_vm11 = vcmp.lt.s32.totalorder %v1787_v63, 17  ;;  %v729_v4 = vadd.s32 128, %v1787_v63 }
  0x21   : > { %s510_s19 = sadd.s32 %s1291_s18, %s508_s15  ;;  %s2086_s13 = smov (!%p528_p2, %s527_s13), 1  ;;  %vm1792_vm12 = vmand %vm730_vm10, %vm732_vm11  ;;  %vm1093_vm11 = vcmask 130048  }
  0x22   : > { %s1292_s20 = sshll.u32 %s510_s19, 2  ;;  %s2088_s30 = smov (!%p1294_p1, %s2084_s30), 1  ;;  %vm737_vm14 = vcmp.ge.s32.totalorder %v729_v4, 145  ;;  %vm739_vm15 = vcmp.lt.s32.totalorder %v729_v4, 161 }
  0x23   : > { %s512_s29 = scalar_lea.vmem %s2054_s0, %s1292_s20  ;;  %s2090_s13 = smov (!%p528_p2, %s2086_s13), 1  ;;  %vm1804_vm1 = vmand %vm737_vm14, %vm739_vm15 }
  0x24   : > { %v1728_v7 = vld [vmem:[%s512_s29] sm:$0xf]  ;;  %s521_s14 = sadd.s32 %s2088_s30, %s1291_s18  ;;  %s1561_s15 = smov 17  }
  0x25   : > { %v562_v8 = vpack.c.bf16 %v1728_v7, %v1728_v7  ;;  %s1300_s19 = sshll.u32 %s521_s14, 2  ;;  %s535_s26 = sadd.s32 %s1291_s18, %s2090_s13 }
  0x26   : > { %s523_s0 = scalar_lea.vmem %s2024_s1, %s1300_s19  ;;  %s1305_s23 = sshll.u32 %s535_s26, 2 }
  0x27   : > { %v570_v9 = vrot.slane %v562_v8, %v555_v6  ;;  %v547_v10 = vld [vmem:[%s523_s0] sm:$0xf]  ;;  %s537_s21 = scalar_lea.vmem %s2025_s2, %s1305_s23  ;;  %p748_p5 = scmp.eq.s32.totalorder %s1541_s24, 1 }
  0x28   : > { %v548_v11 = vpack.c.bf16 %v547_v10, %v547_v10  ;;  %v581_v12 = vld [vmem:[%s537_s21] sm:$0xf]  ;;  %s743_s30 = scalar_select %p742_p4, 1, 0 }
  0x29   : > { %571 = vrot.lane.b32.xlu0 %v570_v9, %s1561_s15  ;;  %v582_v13 = vpack.c.bf16 %v581_v12, %v581_v12  ;;  %s749_s14 = scalar_select %p748_p5, 1, 0 }
  0x2a   : > { %v556_v14 = vrot.slane %v548_v11, %v555_v6  ;;  %v744_v3 = vstv %s743_s30  ;;  %s1570_s13 = smov 112   ;;  %s1571_s18 = smov 96  }
  0x2b   : > { %v590_v15 = vrot.slane %v582_v13, %v555_v6  ;;  %vm1796_vm13 = vcmp.eq.s32.totalorder %v744_v3, 1  ;;  %v750_v8 = vstv %s749_s14  ;;  %v1063_v3 = vld [vmem:[%s2031_s8] sm:$0xff]  ;;  %s1572_s20 = smov 127   ;;  %s1573_s29 = smov 126  }
  0x2c   : > { %vm746_vm0 = vmand %vm1796_vm13, %vm1792_vm12  ;;  %vm1808_vm2 = vcmp.eq.s32.totalorder %v750_v8, 1  ;;  %s502_s21 = sand.u32 1, %s1533_s22  }
  0x2d   : > { %557 = vrot.lane.b32.xlu0 %v556_v14, %s1561_s15  ;;  %591 = vrot.lane.b32.xlu1 %v590_v15, %s1561_s15  ;;  %vm753_vm3 = vmand %vm1808_vm2, %vm1804_vm1  ;;  %s1290_s23 = sshll.u32 %s502_s21, 2  ;;  %s1318_s15 = sshll.u32 %s1545_s25, 1 }
  0x2e   : > { %s1165_s19 = sadd.s32 %s1541_s24, %s1318_s15  ;;  %s504_s27 = scalar_lea.vmem [#allocation3], %s1290_s23 }
  0x2f   : > { %s1319_s26 = sshll.u32 %s1165_s19, 6  ;;  %s1154_s24 = scalar_lea.sflag [#allocation4], %s502_s21 }
  0x30   : > { %s1970_s14 = scalar_lea.hbm %s2035_s12, %s1319_s26 }
  0x31   : > { %671 = vperm.xlu1 %1420, %v667_v16   ;;  %676 = vperm.xlu0 %1421, %v668_v17  }
  0x35   : > { %687 = vperm.xlu1 %1420, %v683_v18   ;;  %1422 = vset.pattern.permute.xlu0 %v1562_v20 }
  0x36   : > { %860 = vperm.xlu0 %1422, %v1750_v19  }
  0x39   : > { %692 = vperm.xlu1 %1420, %v684_v21  }
  0x3a   : > { %1425 = vset.pattern.permute.xlu0 %v1563_v23 }
  0x3b   : > { %963 = vperm.xlu0 %1425, %v1759_v22  }
  0x3d   : > { %1423 = vset.pattern.permute.xlu1 %v1562_v20 }
  0x3e   : > { %864 = vperm.xlu1 %1423, %v1759_v22  }
  0x3f   : > { %1427 = vset.pattern.permute.xlu0 %v1564_v24 }
  0x40   : > { %993 = vperm.xlu0 %1427, %v1750_v19  }
  0x42   : > { %1424 = vset.pattern.permute.xlu1 %v1563_v23 }
  0x43   : > { %959 = vperm.xlu1 %1424, %v1750_v19  }
  0x44   : > { %1430 = vset.pattern.permute.xlu0 %v1565_v25 }
  0x45   : > { %786 = vperm.xlu0 %1430, %v1759_v22  }
  0x47   : > { %1426 = vset.pattern.permute.xlu1 %v1566_v26 }
  0x48   : > { %894 = vperm.xlu1 %1426, %v1750_v19  }
  0x49   : > { %1432 = vset.pattern.permute.xlu0 %v1567_v27 }
  0x4a   : > { %813 = vperm.xlu0 %1432, %v1750_v19  }
  0x4c   : > { %898 = vperm.xlu1 %1426, %v1759_v22  }
  0x4e   : > { %1435 = vset.pattern.permute.xlu0 %v1568_v28 }
  0x4f   : > { %951 = vperm.xlu0 %1435, %v1759_v22  }
  0x50   : > { %1428 = vset.pattern.permute.xlu1 %v1564_v24 }
  0x51   : > { %997 = vperm.xlu1 %1428, %v1759_v22  }
  0x53   : > { %1436 = vset.pattern.permute.xlu0 %v1560_v5 }
  0x55   : > { %1429 = vset.pattern.permute.xlu1 %v1565_v25 }
  0x56   : > { %782 = vperm.xlu1 %1429, %v1750_v19  }
  0x5a   : > { %1431 = vset.pattern.permute.xlu1 %v1569_v29 }
  0x5b   : > { %848 = vperm.xlu1 %1431, %v1750_v19  }
  0x5f   : > { %852 = vperm.xlu1 %1431, %v1759_v22  }
  0x63   : > { %1433 = vset.pattern.permute.xlu1 %v1567_v27 }
  0x64   : > { %817 = vperm.xlu1 %1433, %v1759_v22  }
  0x68   : > { %1434 = vset.pattern.permute.xlu1 %v1568_v28 }
  0x69   : > { %947 = vperm.xlu1 %1434, %v1750_v19  }
  0x6d   : > { %1437 = vset.pattern.permute.xlu1 %v1560_v5 }
  0x9b   : > { %v572_v30 = vpop.permute.xlu0 %571 }
  0x9c   : > { %v573_v31 = vrot.slane %v572_v30, 6 }
  0x9e   : > { %v575_v33 = vsel %vm574_vm4, %v573_v31, %v572_v30  ;;  %vm805_vm4 = vcmask 916480  }
  0x9f   : > { %v558_v32 = vpop.permute.xlu0 %557  ;;  %v592_v34 = vpop.permute.xlu1 %591 }
  0xa0   : > { %561 = vst.msk [vmem:[#allocation2] sm:$0x3] %vm560_vm5, %v558_v32  ;;  %vm836_vm5 = vcmask 785408  }
  0xa1   : > { %580 = vst.msk [vmem:[#allocation2] sm:$0xf] %vm579_vm6, %v575_v33  ;;  %vm1575_vm6 = vmmov 0  }
  0xa2   : > { %595 = vst.msk [vmem:[#allocation2 + $0x2] sm:$0x3] %vm594_vm7, %v592_v34  ;;  %vm939_vm7 = vcmask 1039360  }
  0xa9   : > { %v1307_v35 = vld.sshfl [vmem:[#allocation2] sm:$0x33 pattern:$0x76325410] }
  0xaa   : > { %v612_v36 = vcombine.high %v1307_v35, %v1307_v35  ;;  %v619_v37 = vsel %vm617_vm8, %v1307_v35, 0 }
  0xac   : > { %1308 = vmatprep.subr.msk.bf16.mxu0 %vm617_vm8, %v612_v36  ;;  %vm1040_vm8 = vcmask 1031168  }
  0xad   : > { %625 = vmatpush1.bf16.msra.mxu0 %v619_v37 }
  0xb0   : > { %1309 = vmatmul.mubr.msk.bf16.vlgmr.msra.gmra.mrb[0].mxu0 %vm613_vm9, %v1438_v38  ;;  %v672_v39 = vpop.permute.xlu1 %671  ;;  %v677_v42 = vpop.permute.xlu0 %676 }
  0xb4   : > { %v688_v40 = vpop.permute.xlu1 %687 }
  0xb5   : > { %v861_v10 = vpop.permute.xlu0 %860 }
  0xb8   : > { %v693_v50 = vpop.permute.xlu1 %692 }
  0xba   : > { %v964_v24 = vpop.permute.xlu0 %963 }
  0xbd   : > { %v865_v5 = vpop.permute.xlu1 %864 }
  0xbf   : > { %v994_v31 = vpop.permute.xlu0 %993 }
  0xc2   : > { %v960_v16 = vpop.permute.xlu1 %959 }
  0xc7   : > { %v895_v27 = vpop.permute.xlu1 %894 }
 0x183   : > { %v658_v41 = vpop.f32.mrb[0].mxu0 }
 0x184   : > { %v679_v43 = vmul.f32 %v672_v39, %v658_v41  ;;  %v660_v44 = vpop.f32.mrb[1].mxu0 }
 0x185   : > { %v680_v45 = vmul.f32 %v672_v39, %v660_v44  ;;  %v662_v46 = vpop.f32.mrb[2].mxu0 }
 0x186   : > { %v695_v47 = vadd.f32 %v688_v40, %v679_v43  ;;  %v681_v48 = vmul.f32 %v677_v42, %v662_v46  ;;  %v664_v49 = vpop.f32.mrb[3].mxu0 }
 0x187   : > { %v696_v51 = vadd.f32 %v688_v40, %v680_v45  ;;  %v682_v55 = vmul.f32 %v677_v42, %v664_v49  ;;  %v899_v40 = vpop.permute.xlu1 %898  ;;  %v787_v49 = vpop.permute.xlu0 %786 }
 0x188   : > { %v1310_v52 = vmul.f32 -1.442695, %v695_v47  ;;  %v697_v53 = vadd.f32 %v693_v50, %v681_v48 }
 0x189   : > { %v1311_v54 = vmul.f32 -1.442695, %v696_v51  ;;  %v1781_v57 = vadd.f32 %v693_v50, %v682_v55 }
 0x18a   : > { %1439 = vpow2.f32 %v1310_v52  ;;  %v1312_v56 = vmul.f32 -1.442695, %v697_v53 }
 0x18b   : > { %1441 = vpow2.f32 %v1311_v54  ;;  %v1313_v58 = vmul.f32 -1.442695, %v1781_v57  ;;  %v998_v45 = vpop.permute.xlu1 %997 }
 0x18c   : > { %1443 = vpow2.f32 %v1312_v56 }
 0x18d   : > { %1445 = vpow2.f32 %v1313_v58 }
 0x18f   : > { %v783_v50 = vpop.permute.xlu1 %782 }
 0x193   : > { %v849_v55 = vpop.permute.xlu1 %848 }
 0x194   : > { %v1440_v59 = vpop.eup %1439 }
 0x195   : > { %v1442_v60 = vpop.eup %1441  ;;  %v711_v61 = vadd.f32 1.0, %v1440_v59 }
 0x196   : > { %v1444_v62 = vpop.eup %1443  ;;  %v712_v1 = vadd.f32 1.0, %v1442_v60 }
 0x197   : > { %1447 = vrcp.f32 %v711_v61  ;;  %v713_v2 = vadd.f32 1.0, %v1444_v62  ;;  %v1446_v9 = vpop.eup %1445  ;;  %v853_v58 = vpop.permute.xlu1 %852 }
 0x198   : > { %1449 = vrcp.f32 %v712_v1  ;;  %v714_v17 = vadd.f32 1.0, %v1446_v9 }
 0x199   : > { %1451 = vrcp.f32 %v713_v2  ;;  %v1049_v2 = vld [vmem:[%s2030_s7] sm:$0xff] }
 0x19a   : > { %1453 = vrcp.f32 %v714_v17 }
 0x19b   : > { %v818_v61 = vpop.permute.xlu1 %817 }
 0x1a1   : > { %v1448_v11 = vpop.eup %1447 }
 0x1a2   : > { %v1450_v14 = vpop.eup %1449  ;;  %v723_v15 = vmul.f32 %v1448_v11, %v695_v47 }
 0x1a3   : > { %v724_v18 = vmul.f32 %v1450_v14, %v696_v51  ;;  %v1452_v25 = vpop.eup %1451 }
 0x1a4   : > { %v1817_v20 = vsel %vm746_vm0, 0.0, %v723_v15  ;;  %v725_v29 = vmul.f32 %v1452_v25, %v697_v53  ;;  %v1454_v35 = vpop.eup %1453  ;;  %v814_v53 = vpop.permute.xlu0 %813 }
 0x1a5   : > { %v966_v21 = vmul.f32 %v960_v16, %v1817_v20  ;;  %v867_v23 = vmul.f32 %v861_v10, %v1817_v20  ;;  %v1830_v26 = vsel %vm753_vm3, 0.0, %v724_v18  ;;  %v901_v28 = vmul.f32 %v895_v27, %v1817_v20 }
 0x1a6   : > { %v868_v30 = vmul.f32 %v861_v10, %v1830_v26  ;;  %v1000_v32 = vmul.f32 %v994_v31, %v1817_v20  ;;  %v1844_v33 = vsel %vm746_vm0, 0.0, %v725_v29  ;;  %v967_v34 = vmul.f32 %v960_v16, %v1830_v26 }
 0x1a7   : > { %974 = vrot.lane.b32.xlu0 %v966_v21, %s1570_s13  ;;  %875 = vrot.lane.b32.xlu1 %v867_v23, %s1570_s13  ;;  %v869_v36 = vmul.f32 %v865_v5, %v1844_v33  ;;  %v902_v37 = vmul.f32 %v895_v27, %v1830_v26  ;;  %v726_v38 = vmul.f32 %v1454_v35, %v1781_v57  ;;  %v1064_v57 = vld [vmem:[%s2031_s8 + $0x8] sm:$0xff] }
 0x1a8   : > { %v968_v39 = vmul.f32 %v964_v24, %v1844_v33  ;;  %v1001_v41 = vmul.f32 %v994_v31, %v1830_v26  ;;  %v903_v43 = vmul.f32 %v899_v40, %v1844_v33  ;;  %v1002_v46 = vmul.f32 %v998_v45, %v1844_v33  ;;  %v952_v4 = vpop.permute.xlu0 %951 }
 0x1a9   : > { %v1861_v42 = vsel %vm753_vm3, 0.0, %v726_v38  ;;  %v790_v51 = vmul.f32 %v783_v50, %v1830_v26  ;;  %v821_v54 = vmul.f32 %v814_v53, %v1830_v26  ;;  %v789_v56 = vmul.f32 %v783_v50, %v1817_v20 }
 0x1aa   : > { %v870_v44 = vmul.f32 %v865_v5, %v1861_v42  ;;  %v969_v47 = vmul.f32 %v964_v24, %v1861_v42  ;;  %v904_v48 = vmul.f32 %v899_v40, %v1861_v42  ;;  %v1003_v52 = vmul.f32 %v998_v45, %v1861_v42  ;;  %v948_v5 = vpop.permute.xlu1 %947 }
 0x1ab   : > { %909 = vrot.lane.b32.xlu0 %v901_v28, %s1571_s18  ;;  %877 = vrot.lane.b32.xlu1 %v868_v30, %s1570_s13  ;;  %v791_v59 = vmul.f32 %v787_v49, %v1844_v33  ;;  %v820_v60 = vmul.f32 %v814_v53, %v1817_v20  ;;  %v823_v62 = vmul.f32 %v818_v61, %v1861_v42 }
 0x1ac   : > { %v822_v1 = vmul.f32 %v818_v61, %v1844_v33  ;;  %v856_v12 = vmul.f32 %v849_v55, %v1830_v26  ;;  %v855_v14 = vmul.f32 %v849_v55, %v1817_v20  ;;  %v955_v18 = vmul.f32 %v948_v5, %v1830_v26 }
 0x1ad   : > { %v954_v25 = vmul.f32 %v948_v5, %v1817_v20  ;;  %v858_v38 = vmul.f32 %v853_v58, %v1861_v42  ;;  %v857_v40 = vmul.f32 %v853_v58, %v1844_v33  ;;  %v956_v50 = vmul.f32 %v952_v4, %v1844_v33  ;;  %v1137_v58 = vld [vmem:[%s2033_s10] sm:$0xf] }
 0x1af   : > { %1008 = vrot.lane.b32.xlu0 %v1000_v32, %s1571_s18  ;;  %976 = vrot.lane.b32.xlu1 %v967_v34, %s1570_s13 }
 0x1b3   : > { %879 = vrot.lane.b32.xlu0 %v869_v36, %s1570_s13  ;;  %911 = vrot.lane.b32.xlu1 %v902_v37, %s1571_s18 }
 0x1b7   : > { %978 = vrot.lane.b32.xlu0 %v968_v39, %s1570_s13  ;;  %1010 = vrot.lane.b32.xlu1 %v1001_v41, %s1571_s18 }
 0x1bb   : > { %913 = vrot.lane.b32.xlu0 %v903_v43, %s1571_s18  ;;  %881 = vrot.lane.b32.xlu1 %v870_v44, %s1570_s13 }
 0x1bf   : > { %1012 = vrot.lane.b32.xlu0 %v1002_v46, %s1571_s18  ;;  %980 = vrot.lane.b32.xlu1 %v969_v47, %s1570_s13  ;;  %v957_v46 = vmul.f32 %v952_v4, %v1861_v42 }
 0x1c3   : > { %771 = vperm.xlu0 %1436, %v1750_v19   ;;  %915 = vrot.lane.b32.xlu1 %v904_v48, %s1571_s18  ;;  %v1050_v19 = vld [vmem:[%s2030_s7 + $0x8] sm:$0xff] }
 0x1c7   : > { %799 = vrot.lane.b32.xlu0 %v790_v51, %s1570_s13  ;;  %1014 = vrot.lane.b32.xlu1 %v1003_v52, %s1571_s18 }
 0x1cb   : > { %830 = vrot.lane.b32.xlu0 %v821_v54, %s1571_s18  ;;  %776 = vperm.xlu1 %1437, %v1759_v22   ;;  %v792_v22 = vmul.f32 %v787_v49, %v1861_v42 }
 0x1cf   : > { %1058 = vperm.xlu0 %1436, %v1050_v19   ;;  %797 = vrot.lane.b32.xlu1 %v789_v56, %s1570_s13 }
 0x1d3   : > { %1072 = vperm.xlu0 %1436, %v1064_v57   ;;  %801 = vrot.lane.b32.xlu1 %v791_v59, %s1570_s13  ;;  %v1144_v57 = vld [vmem:[%s2034_s11] sm:$0xf] }
 0x1d7   : > { %803 = vrot.lane.b32.xlu0 %v792_v22, %s1570_s13  ;;  %828 = vrot.lane.b32.xlu1 %v820_v60, %s1571_s18  ;;  %v1574_v22 = vmov 0.0   ;;  %s1576_s13 = smov [#allocation3]  }
 0x1d8   : > { %1326 = vmatprep.subr.bf16.mxu1 %v1574_v22  ;;  %1328 = vmatprep.mubr.msk.bf16.mxu1 %vm1575_vm6, %v1574_v22 }
 0x1db   : > { %834 = vrot.lane.b32.xlu0 %v823_v62, %s1571_s18  ;;  %832 = vrot.lane.b32.xlu1 %v822_v1, %s1571_s18  ;;  %s1467_s18 = sshll.u32 %s1576_s13, 4  ;;  %s1468_s18 = int_to_ptr.vmem [resolvable:$false] %s1467_s18 }
 0x1dc   : > { %s1469_s0 = scalar_lea.vmem %s1468_s18, 128 }
 0x1df   : > { %1053 = vperm.xlu1 %1437, %v1049_v2  }
 0x1e3   : > { %1067 = vperm.xlu1 %1437, %v1063_v3  }
 0x219   : > { %v975_v6 = vpop.permute.xlu0 %974  ;;  %v876_v0 = vpop.permute.xlu1 %875 }
 0x21d   : > { %v910_v8 = vpop.permute.xlu0 %909  ;;  %v878_v9 = vpop.permute.xlu1 %877 }
 0x21e   : > { %v883_v13 = vsel %vm805_vm4, %v876_v0, %v878_v9  ;;  %v890_v15 = vadd.f32 %v878_v9, %v856_v12 }
 0x21f   : > { %v889_v16 = vadd.f32 %v883_v13, %v855_v14 }
 0x221   : > { %v977_v10 = vpop.permute.xlu1 %976  ;;  %v1009_v11 = vpop.permute.xlu0 %1008 }
 0x222   : > { %v982_v21 = vsel %vm805_vm4, %v975_v6, %v977_v10  ;;  %v989_v29 = vadd.f32 %v977_v10, %v955_v18 }
 0x223   : > { %v988_v30 = vadd.f32 %v982_v21, %v954_v25 }
 0x225   : > { %v912_v17 = vpop.permute.xlu1 %911  ;;  %v880_v28 = vpop.permute.xlu0 %879 }
 0x226   : > { %v917_v23 = vsel %vm836_vm5, %v910_v8, %v912_v17  ;;  %v924_v24 = vadd.f32 %v912_v17, %v890_v15 }
 0x227   : > { %v923_v27 = vadd.f32 %v917_v23, %v889_v16 }
 0x228   : > { %933 = vrot.lane.b32.xlu0 %v924_v24, %s1572_s20  ;;  %v766_v24 = vand.u32 15, %v1787_v63 }
 0x229   : > { %v1011_v31 = vpop.permute.xlu1 %1010  ;;  %931 = vrot.lane.b32.xlu1 %v923_v27, %s1572_s20  ;;  %v979_v35 = vpop.permute.xlu0 %978 }
 0x22a   : > { %v1016_v32 = vsel %vm836_vm5, %v1009_v11, %v1011_v31  ;;  %v1023_v26 = vadd.f32 %v1011_v31, %v989_v29  ;;  %vm1940_vm9 = vcmp.ne.s32.totalorder %v766_v24, 0  ;;  %vm1944_vm10 = vcmp.ne.s32.totalorder %v766_v24, 15 }
 0x22b   : > { %v1022_v34 = vadd.f32 %v1016_v32, %v988_v30 }
 0x22c   : > { %1034 = vrot.lane.b32.xlu0 %v1023_v26, %s1573_s29 }
 0x22d   : > { %v882_v36 = vpop.permute.xlu1 %881  ;;  %1032 = vrot.lane.b32.xlu1 %v1022_v34, %s1573_s29  ;;  %v914_v41 = vpop.permute.xlu0 %913 }
 0x22e   : > { %v884_v39 = vsel %vm805_vm4, %v880_v28, %v882_v36  ;;  %v892_v43 = vadd.f32 %v882_v36, %v858_v38 }
 0x22f   : > { %v891_v44 = vadd.f32 %v884_v39, %v857_v40 }
 0x231   : > { %v981_v37 = vpop.permute.xlu1 %980  ;;  %v1013_v54 = vpop.permute.xlu0 %1012 }
 0x232   : > { %v983_v47 = vsel %vm805_vm4, %v979_v35, %v981_v37  ;;  %v991_v52 = vadd.f32 %v981_v37, %v957_v46 }
 0x233   : > { %v990_v53 = vadd.f32 %v983_v47, %v956_v50 }
 0x235   : > { %v916_v45 = vpop.permute.xlu1 %915 }
 0x236   : > { %v918_v48 = vsel %vm836_vm5, %v914_v41, %v916_v45  ;;  %v926_v49 = vadd.f32 %v916_v45, %v892_v43 }
 0x237   : > { %v925_v51 = vadd.f32 %v918_v48, %v891_v44 }
 0x238   : > { %937 = vrot.lane.b32.xlu0 %v926_v49, %s1572_s20 }
 0x239   : > { %v1015_v55 = vpop.permute.xlu1 %1014  ;;  %935 = vrot.lane.b32.xlu1 %v925_v51, %s1572_s20  ;;  %s1169_s20 = sshll.u32 %s504_s27, 4  ;;  %s1972_s20 = int_to_ptr.vmem [resolvable:$true] %s1169_s20 }
 0x23a   : > { %v1017_v19 = vsel %vm836_vm5, %v1013_v54, %v1015_v55  ;;  %v1025_v56 = vadd.f32 %v1015_v55, %v991_v52  ;;  %s1463_s25 = scalar_lea.vmem %s1972_s20, 64  ;;  %p1470_p10 = scmp.lt.s32.totalorder %s1972_s20, %s1468_s18 }
 0x23b   : > { %v1024_v42 = vadd.f32 %v1017_v19, %v990_v53  ;;  %p1464_p6 = scmp.ne.s32.totalorder %s1972_s20, %s1463_s25  ;;  %p1471_p11 = scmp.lt.s32.totalorder %s1469_s0, %s1463_s25 }
 0x23c   : > { %1038 = vrot.lane.b32.xlu0 %v1025_v56, %s1573_s29 }
 0x23d   : > { %1036 = vrot.lane.b32.xlu1 %v1024_v42, %s1573_s29  ;;  %p1465_p7 = pnand %p1464_p6, %p1693_p3  ;;  %p1472_p12 = por %p1471_p11, %p1470_p10 }
 0x23f   : > { %p1466_p9 = pneg %p1465_p7 }
 0x240   : > { %1147 = vperm.xlu0 %1436, %v1144_v57  }
 0x241   : > { %1140 = vperm.xlu1 %1437, %v1137_v58   ;;  %p1473_p13 = pnand %p1472_p12, %p1466_p9 }
 0x242   : > { %v772_v59 = vpop.permute.xlu0 %771 }
 0x243   : > { %v779_v6 = vmul.f32 %v772_v59, %v1817_v20  ;;  %v1091_v59 = vld [vmem:[%s2032_s9] sm:$0x3] }
 0x246   : > { %v800_v60 = vpop.permute.xlu0 %799 }
 0x24a   : > { %v831_v61 = vpop.permute.xlu0 %830  ;;  %v777_v62 = vpop.permute.xlu1 %776 }
 0x24b   : > { %v780_v12 = vmul.f32 %v777_v62, %v1844_v33 }
 0x24e   : > { %v1059_v1 = vpop.permute.xlu0 %1058  ;;  %v798_v2 = vpop.permute.xlu1 %797 }
 0x24f   : > { %v806_v5 = vsel %vm805_vm4, %v798_v2, %v800_v60 }
 0x250   : > { %v810_v8 = vadd.f32 %v806_v5, %v779_v6 }
 0x252   : > { %v1073_v3 = vpop.permute.xlu0 %1072  ;;  %v802_v4 = vpop.permute.xlu1 %801 }
 0x256   : > { %v804_v0 = vpop.permute.xlu0 %803  ;;  %v829_v9 = vpop.permute.xlu1 %828 }
 0x257   : > { %v837_v10 = vsel %vm836_vm5, %v829_v9, %v831_v61  ;;  %v807_v11 = vsel %vm805_vm4, %v802_v4, %v804_v0 }
 0x258   : > { %v841_v13 = vadd.f32 %v837_v10, %v810_v8  ;;  %v811_v15 = vadd.f32 %v807_v11, %v780_v12 }
 0x25a   : > { %v835_v14 = vpop.permute.xlu0 %834  ;;  %v833_v16 = vpop.permute.xlu1 %832  ;;  %v845_v63 = vsel %vm1940_vm9, %v841_v13, 0.0 }
 0x25b   : > { %v838_v17 = vsel %vm836_vm5, %v833_v16, %v835_v14 }
 0x25c   : > { %v842_v18 = vadd.f32 %v838_v17, %v811_v15 }
 0x25e   : > { %v1054_v21 = vpop.permute.xlu1 %1053  ;;  %v846_v41 = vsel %vm1940_vm9, %v842_v18, 0.0 }
 0x262   : > { %v1068_v20 = vpop.permute.xlu1 %1067 }
 0x29a   : > { %v934_v23 = vpop.permute.xlu0 %933 }
 0x29b   : > { %v932_v25 = vpop.permute.xlu1 %931 }
 0x29c   : > { %v940_v29 = vsel %vm939_vm7, %v932_v25, %v934_v23 }
 0x29d   : > { %v944_v26 = vadd.f32 %v940_v29, %v845_v63 }
 0x29e   : > { %v1035_v33 = vpop.permute.xlu0 %1034 }
 0x29f   : > { %v1033_v30 = vpop.permute.xlu1 %1032 }
 0x2a0   : > { %v1041_v31 = vsel %vm1040_vm8, %v1033_v30, %v1035_v33 }
 0x2a1   : > { %v1045_v32 = vsel %vm1944_vm10, %v1041_v31, 0.0 }
 0x2a2   : > { %v1047_v34 = vadd.f32 %v1045_v32, %v944_v26 }
 0x2a4   : > { %v1061_v35 = vmul.f32 %v1054_v21, %v1047_v34 }
 0x2a6   : > { %v1075_v38 = vadd.f32 %v1068_v20, %v1061_v35 }
 0x2a8   : > { %v1314_v46 = vmul.f32 -1.442695, %v1075_v38 }
 0x2aa   : > { %v938_v36 = vpop.permute.xlu0 %937  ;;  %1455 = vpow2.f32 %v1314_v46 }
 0x2ab   : > { %v936_v37 = vpop.permute.xlu1 %935 }
 0x2ac   : > { %v941_v39 = vsel %vm939_vm7, %v936_v37, %v938_v36 }
 0x2ad   : > { %v945_v44 = vadd.f32 %v941_v39, %v846_v41 }
 0x2ae   : > { %v1039_v40 = vpop.permute.xlu0 %1038 }
 0x2af   : > { %v1037_v43 = vpop.permute.xlu1 %1036 }
 0x2b0   : > { %v1042_v45 = vsel %vm1040_vm8, %v1037_v43, %v1039_v40 }
 0x2b1   : > { %v1046_v47 = vsel %vm1944_vm10, %v1042_v45, 0.0 }
 0x2b2   : > { %v1048_v48 = vadd.f32 %v1046_v47, %v945_v44 }
 0x2b4   : > { %v1062_v49 = vmul.f32 %v1059_v1, %v1048_v48  ;;  %v1456_v52 = vpop.eup %1455 }
 0x2b5   : > { %v1083_v53 = vadd.f32 1.0, %v1456_v52 }
 0x2b6   : > { %v1076_v50 = vadd.f32 %v1073_v3, %v1062_v49 }
 0x2b8   : > { %v1315_v51 = vmul.f32 -1.442695, %v1076_v50 }
 0x2ba   : > { %1457 = vpow2.f32 %v1315_v51 }
 0x2bb   : > { %1459 = vrcp.f32 %v1083_v53 }
 0x2bf   : > { %v1148_v1 = vpop.permute.xlu0 %1147 }
 0x2c0   : > { %v1141_v22 = vpop.permute.xlu1 %1140 }
 0x2c4   : > { %v1458_v54 = vpop.eup %1457 }
 0x2c5   : > { %v1084_v55 = vadd.f32 1.0, %v1458_v54  ;;  %v1460_v19 = vpop.eup %1459 }
 0x2c6   : > { %v1089_v42 = vmul.f32 %v1460_v19, %v1075_v38 }
 0x2c7   : > { %1461 = vrcp.f32 %v1084_v55 }
 0x2d1   : > { %v1462_v56 = vpop.eup %1461 }
 0x2d2   : > { %v1090_v57 = vmul.f32 %v1462_v56, %v1076_v50 }
 0x2d4   : > { %v1092_v58 = vpack.c.bf16 %v1090_v57, %v1089_v42 }
 0x2d6   : > { %1327 = vmatpush3.bf16.msra.mxu1 %v1092_v58 }
 0x2d9   : > { %1329 = vmatmul.mubr.msk.bf16.vlgmr.msra.gmra.mrb[0].mxu1 %vm1093_vm11, %v1091_v59 }
 0x3ac   : > { %v1131_v60 = vpop.f32.mrb[0].mxu1 }
 0x3ad   : > { %v1143_v61 = vmul.f32 %v1141_v22, %v1131_v60  ;;  %v1330_v62 = vpop.f32.mrb[1].mxu1 }
 0x3ae   : > { %v1134_v2 = vpop.f32.mrb[2].mxu1 }
 0x3af   : > { %v1150_v3 = vadd.f32 %v1148_v1, %v1143_v61  ;;  %v1331_v4 = vpop.f32.mrb[3].mxu1 }
 0x3b1   : > { %v1151_v5 = vadd.f32 %v1150_v3, %v1728_v7 }
 0x3b3   : > { %1152 = vst [vmem:[%s504_s27] sm:$0xf] %v1151_v5 }
 0x3b4   : > { %1476 = shalt.err (!%p1473_p13)
}
 0x3b5   : > { %s1477_s17 = scalar_lea.hbm %s1970_s14, 64  ;;  %s1481_s15 = scalar_lea.hbm %s2035_s12, 256 }
 0x3b6   : > { %p1478_p0 = scmp.ne.s32.totalorder %s1970_s14, %s1477_s17  ;;  %p1482_p4 = scmp.lt.u32.totalorder %s1970_s14, %s2035_s12 }
 0x3b7   : > { %p1483_p5 = scmp.lt.u32.totalorder %s1481_s15, %s1477_s17  ;;  %p1485_p7 = scmp.lt.u32.totalorder %s1477_s17, %s1970_s14 }
 0x3b8   : > { %p1479_p1 = pnand %p1478_p0, %p1693_p3 }
 0x3b9   : > { %p1484_p6 = por %p1483_p5, %p1482_p4 }
 0x3ba   : > { %p1480_p2 = pneg %p1479_p1 }
 0x3bb   : > { %p1486_p9 = por %p1485_p7, %p1484_p6 }
 0x3bd   : > { %p1487_p10 = pnand %p1486_p9, %p1480_p2 }
 0x3bf   : > { %1490 = shalt.err (!%p1487_p10)
}
 0x3c0   : > { %1332 = dma.vmem_to_hbm [thread:$0]  (%p1693_p3), %s1972_s20, 64, %s1970_s14, %s1154_s24  }
 0x3c1 PF: > { %s2067_s27 = sld [smem:[#allocation6_spill]]  ;;  %p1338_p11 = scmp.ge.s32.totalorder %s1557_s28, 2 }
 0x3c3   : > { %p1335_p12 = pnand %p1338_p11, %p1702_p8 }
 0x3c7   : > { %s1181_s30 = sand.u32 1, %s2067_s27  }
 0x3c8   : > { %s1182_s25 = scalar_lea.sflag [#allocation4], %s1181_s30 }
 0x3c9   : > { %1524 = dma.done.wait (!%p1335_p12), %s1182_s25, 64  }
 0x3ca   : > { %1526 = vsyncadd (!%p1335_p12), %s1182_s25, 4294967232  ;;  %s25_s28 = sadd.s32 1, %s1557_s28   ;;  %s2069_s13 = sld [smem:[#allocation7_spill]] }
 0x3cb   : > { %p22_p13 = scmp.ge.s32.totalorder %s25_s28, 6   ;;  %s2070_s23 = sld [smem:[#allocation13_spill]] }
 0x3cc   : > { %s2071_s24 = sld [smem:[#allocation8_spill]]  ;;  %s2072_s25 = sld [smem:[#allocation9_spill]] }
 0x3cd   : > { %s2073_s26 = sld [smem:[#allocation10_spill]]  ;;  %s2074_s27 = sld [smem:[#allocation11_spill]] }
 0x3ce   : > { %s2075_s21 = smov %s1533_s22  ;;  %24 = sbr.rel (!%p22_p13) target bundleno = 7 (0x7), region = 109 }
 0x3d0   : > { %s2076_s22 = smov %s2069_s13 }
 0x3d5   :  { %1187 = vsyncpa [#allocation4], 1 }
 0x3d6   :  { %1189 = vsyncpa [#allocation4 + $0x1], 1 }

</bundles_post_ra>
